<compile_context>
chip_gen: v5e
topology: v5e:2x2
jax: 0.10.0
libtpu: 0.0.40
codegen_flags: <defaults>
</compile_context>

<pallas_src>
import jax
import jax.numpy as jnp
from jax.experimental import pallas as pl
from jax.experimental.pallas import tpu as pltpu

_EPS = 2.3e-08                    # exact constant from the PyTorch module
_LANE = 128
_TARGET_BLOCK_BYTES = 2 * 1024 * 1024   # ~2 MiB per array block


def _adain_kernel(x_ref, y_ref, o_ref):
    # x_ref / y_ref / o_ref: (TB, S, TD) VMEM tiles. Stats are per (b, d), so
    # the S-reduction stays entirely within the tile — no cross-tile accumulation.
    x = x_ref[...].astype(jnp.float32)
    y = y_ref[...].astype(jnp.float32)
    s = x.shape[1]

    # Per-(batch, feature) statistics, shape (TB, 1, TD).
    mu_x = jnp.sum(x, axis=1, keepdims=True) / s
    mu_y = jnp.sum(y, axis=1, keepdims=True) / s
    xc = x - mu_x
    yc = y - mu_y
    ss_x = jnp.sum(xc * xc, axis=1, keepdims=True)
    ss_y = jnp.sum(yc * yc, axis=1, keepdims=True)

    # sigma(y) / sigma(x) fused into one per-(b, d) scale; rsqrt removes the
    # full-tile divide, leaving only D-sized transcendentals off the hot path.
    inv_sig_x = jax.lax.rsqrt((ss_x + _EPS) / s)
    sig_y = jnp.sqrt((ss_y + _EPS) / s)
    scale = sig_y * inv_sig_x                      # (TB, 1, TD)

    # Hot path over the full tile: one subtract (already done) + one FMA.
    o_ref[...] = (xc * scale + mu_y).astype(o_ref.dtype)


def _pick_tiles(B, S, D, itemsize):
    """Choose (TB, TD): lane-dense feature tiles, ~2 MiB blocks, exact divisors."""
    # Feature-axis tile: multiple of 128 dividing D when possible, else full D
    # (full-extent last dim satisfies the (8, 128) BlockSpec rule for small D).
    if D % _LANE == 0:
        cands = [d for d in range(_LANE, D + 1, _LANE) if D % d == 0]
        fitting = [d for d in cands if S * d * itemsize <= _TARGET_BLOCK_BYTES]
        td = max(fitting) if fitting else min(cands)
    else:
        td = D
    # Batch packing: amortize the ~0.35 us per-grid-step overhead.
    per_row = S * td * itemsize
    tb_cap = max(1, _TARGET_BLOCK_BYTES // per_row)
    tb = 1
    for cand in range(min(B, tb_cap), 0, -1):
        if B % cand == 0:
            tb = cand
            break
    return tb, td


def adain_trans(x, y):
    """Pallas implementation of AdaIN_trans.forward(x, y). x, y: [B, S, D]."""
    assert x.shape == y.shape and x.ndim == 3
    B, S, D = x.shape
    itemsize = jnp.dtype(x.dtype).itemsize
    tb, td = _pick_tiles(B, S, D, itemsize)
    grid = (B // tb, D // td)

    spec = pl.BlockSpec((tb, S, td), lambda b, d: (b, 0, d))

    # VMEM budget: 3 arrays x 2 pipeline buffers x block + ~4 f32 tile temps
    # in the body, with 2x headroom, capped at v7x's 64 MiB physical VMEM.
    block_bytes = tb * S * td * itemsize
    vmem_limit = int(min(max(2 * (6 * block_bytes + 4 * tb * S * td * 4),
                             16 * 1024 * 1024),
                         64 * 1024 * 1024))

    return pl.pallas_call(
        _adain_kernel,
        out_shape=jax.ShapeDtypeStruct((B, S, D), x.dtype),
        grid_spec=pl.GridSpec(
            grid=grid,
            in_specs=[spec, spec],
            out_specs=spec,
        ),
        compiler_params=pltpu.CompilerParams(
            dimension_semantics=("parallel", "parallel"),
            vmem_limit_bytes=vmem_limit,
        ),
    )(x, y)


def adain_trans_ref(x, y):
    """Pure-JAX reference mirroring the PyTorch math exactly."""
    s = x.shape[1]
    mu = lambda t: jnp.sum(t, axis=1, keepdims=True) / s
    sigma = lambda t: jnp.sqrt(
        (jnp.sum((t - mu(t)) ** 2, axis=1, keepdims=True) + _EPS) / s)
    return sigma(y) * ((x - mu(x)) / sigma(x)) + mu(y)


# TODO(synk): the surrounding CustomCLIP graph (CLIP visual/text transformers,
# InjectionBlock / meta_net Linear+ReLU+Sigmoid stacks, prompt assembly) is left
# to standard JAX/XLA; only the AdaIN_trans hot path is implemented in Pallas.

if __name__ == "__main__":
    key = jax.random.PRNGKey(0)
    # Small-shape demo (D=32, full-extent lanes) plus a lane-dense D=256 case
    # that exercises the multiple-of-128 feature tiling / batch packing path.
    for (B, S, D) in [(2, 8, 32), (4, 16, 256)]:
        key, kx, ky = jax.random.split(key, 3)
        x = jax.random.normal(kx, (B, S, D), dtype=jnp.float32)
        y = 2.0 * jax.random.normal(ky, (B, S, D), dtype=jnp.float32) + 0.5

        out = jax.block_until_ready(adain_trans(x, y))
        ref = adain_trans_ref(x, y)

        assert out.shape == (B, S, D)
        assert jnp.allclose(out, ref, atol=1e-5, rtol=1e-5), f"mismatch at {(B, S, D)}"

    print("KERNEL_OK")
</pallas_src>

<mosaic_0001>
module attributes {stable_mosaic.version = 11 : i64} {
  func.func @_adain_kernel(%arg0: i32, %arg1: i32, %arg2: memref<2x8x32xf32, #tpu.memory_space<vmem>>, %arg3: memref<2x8x32xf32, #tpu.memory_space<vmem>>, %arg4: memref<2x8x32xf32, #tpu.memory_space<vmem>>) attributes {dimension_semantics = [#tpu.dimension_semantics<parallel>, #tpu.dimension_semantics<parallel>], iteration_bounds = array<i64: 1, 1>, scalar_prefetch = 0 : i64, scratch_operands = 0 : i64, tpu.core_type = #tpu.core_type<tc>, window_params = [{transform_indices = @transform_0, window_bounds = array<i64: 2, 8, 32>}, {transform_indices = @transform_1, window_bounds = array<i64: 2, 8, 32>}, {transform_indices = @transform_2, window_bounds = array<i64: 2, 8, 32>}]} {
    %c0 = arith.constant 0 : index
    %c0_0 = arith.constant 0 : index
    %c0_1 = arith.constant 0 : index
    %0 = vector.load %arg2[%c0, %c0_0, %c0_1] : memref<2x8x32xf32, #tpu.memory_space<vmem>>, vector<2x8x32xf32>
    %c0_2 = arith.constant 0 : index
    %c0_3 = arith.constant 0 : index
    %c0_4 = arith.constant 0 : index
    %1 = vector.load %arg3[%c0_2, %c0_3, %c0_4] : memref<2x8x32xf32, #tpu.memory_space<vmem>>, vector<2x8x32xf32>
    %cst = arith.constant dense<0.000000e+00> : vector<2x32xf32>
    %2 = vector.multi_reduction <add>, %0, %cst [1] : vector<2x8x32xf32> to vector<2x32xf32>
    %3 = vector.shape_cast %2 : vector<2x32xf32> to vector<2x1x32xf32>
    %cst_5 = arith.constant 8.000000e+00 : f32
    %4 = vector.broadcast %cst_5 : f32 to vector<2x1x32xf32>
    %5 = arith.divf %3, %4 : vector<2x1x32xf32>
    %cst_6 = arith.constant dense<0.000000e+00> : vector<2x32xf32>
    %6 = vector.multi_reduction <add>, %1, %cst_6 [1] : vector<2x8x32xf32> to vector<2x32xf32>
    %7 = vector.shape_cast %6 : vector<2x32xf32> to vector<2x1x32xf32>
    %cst_7 = arith.constant 8.000000e+00 : f32
    %8 = vector.broadcast %cst_7 : f32 to vector<2x1x32xf32>
    %9 = arith.divf %7, %8 : vector<2x1x32xf32>
    %10 = vector.broadcast %5 : vector<2x1x32xf32> to vector<2x8x32xf32>
    %11 = arith.subf %0, %10 : vector<2x8x32xf32>
    %12 = vector.broadcast %9 : vector<2x1x32xf32> to vector<2x8x32xf32>
    %13 = arith.subf %1, %12 : vector<2x8x32xf32>
    %14 = arith.mulf %11, %11 : vector<2x8x32xf32>
    %cst_8 = arith.constant dense<0.000000e+00> : vector<2x32xf32>
    %15 = vector.multi_reduction <add>, %14, %cst_8 [1] : vector<2x8x32xf32> to vector<2x32xf32>
    %16 = vector.shape_cast %15 : vector<2x32xf32> to vector<2x1x32xf32>
    %17 = arith.mulf %13, %13 : vector<2x8x32xf32>
    %cst_9 = arith.constant dense<0.000000e+00> : vector<2x32xf32>
    %18 = vector.multi_reduction <add>, %17, %cst_9 [1] : vector<2x8x32xf32> to vector<2x32xf32>
    %19 = vector.shape_cast %18 : vector<2x32xf32> to vector<2x1x32xf32>
    %cst_10 = arith.constant 2.300000e-08 : f32
    %20 = vector.broadcast %cst_10 : f32 to vector<2x1x32xf32>
    %21 = arith.addf %16, %20 : vector<2x1x32xf32>
    %cst_11 = arith.constant 8.000000e+00 : f32
    %22 = vector.broadcast %cst_11 : f32 to vector<2x1x32xf32>
    %23 = arith.divf %21, %22 : vector<2x1x32xf32>
    %24 = math.rsqrt %23 : vector<2x1x32xf32>
    %cst_12 = arith.constant 2.300000e-08 : f32
    %25 = vector.broadcast %cst_12 : f32 to vector<2x1x32xf32>
    %26 = arith.addf %19, %25 : vector<2x1x32xf32>
    %cst_13 = arith.constant 8.000000e+00 : f32
    %27 = vector.broadcast %cst_13 : f32 to vector<2x1x32xf32>
    %28 = arith.divf %26, %27 : vector<2x1x32xf32>
    %29 = math.sqrt %28 : vector<2x1x32xf32>
    %30 = arith.mulf %29, %24 : vector<2x1x32xf32>
    %31 = vector.broadcast %30 : vector<2x1x32xf32> to vector<2x8x32xf32>
    %32 = arith.mulf %11, %31 : vector<2x8x32xf32>
    %33 = vector.broadcast %9 : vector<2x1x32xf32> to vector<2x8x32xf32>
    %34 = arith.addf %32, %33 : vector<2x8x32xf32>
    %c0_14 = arith.constant 0 : index
    %c0_15 = arith.constant 0 : index
    %c0_16 = arith.constant 0 : index
    %35 = vector.load %arg4[%c0_14, %c0_15, %c0_16] : memref<2x8x32xf32, #tpu.memory_space<vmem>>, vector<2x8x32xf32>
    tpu.vector_store %arg4[%c0_14, %c0_15, %c0_16], %34 {strides = array<i32>} : memref<2x8x32xf32, #tpu.memory_space<vmem>>, vector<2x8x32xf32>,
    return
  }
  func.func @transform_0(%arg0: i32, %arg1: i32) -> (i32, i32, i32) {
    %c0_i32 = arith.constant 0 : i32
    %c0_i32_0 = arith.constant 0 : i32
    return %arg0, %c0_i32, %arg1 : i32, i32, i32
  }
  func.func @transform_1(%arg0: i32, %arg1: i32) -> (i32, i32, i32) {
    %c0_i32 = arith.constant 0 : i32
    %c0_i32_0 = arith.constant 0 : i32
    return %arg0, %c0_i32, %arg1 : i32, i32, i32
  }
  func.func @transform_2(%arg0: i32, %arg1: i32) -> (i32, i32, i32) {
    %c0_i32 = arith.constant 0 : i32
    %c0_i32_0 = arith.constant 0 : i32
    return %arg0, %c0_i32, %arg1 : i32, i32, i32
  }
}

</mosaic_0001>

<bundles_post_ra>
// kernel: tpu_custom_call.1
= control target key start
LH: loop header
LB: loop body
LE: loop exit
PB: predicated region body
PF: predicated region fallthrough
CT: control target
= control target key end

     0   :  { %7 = vsyncpa [#allocation3], 0  ;;  %s371_s0 = inlined_call_operand.hbm [shape: f32[2,8,32], index: 0, kind: input, shape index: {}]   ;;  %s372_s1 = inlined_call_operand.hbm [shape: f32[2,8,32], index: 1, kind: input, shape index: {}]   ;;  %s373_s2 = inlined_call_operand.hbm [shape: f32[2,8,32], index: 2, kind: output, shape index: {}]  }
   0x1   :  { %8 = vsyncpa [#allocation6], 0 }
   0x2   :  { %9 = vsyncpa [#allocation4], 0  ;;  %s14_s11 = sshll.u32 %s371_s0, 4  ;;  %s298_s12 = smov [#allocation2]   ;;  %s15_s11 = int_to_ptr.hbm [resolvable:$true] %s14_s11 }
   0x3   :  { %s16_s13 = sshll.u32 %s298_s12, 4  ;;  %s27_s16 = sshll.u32 %s372_s1, 4  ;;  %s17_s13 = int_to_ptr.vmem [resolvable:$true] %s16_s13  ;;  %s28_s16 = int_to_ptr.hbm [resolvable:$true] %s27_s16 }
   0x4   :  { %s299_s17 = smov 128   ;;  %s300_s18 = smov 8  }
   0x5   :  { %22 = dma.hbm_to_vmem [thread:$0]  %s15_s11, 256, %s17_s13, [#allocation3], %s299_s17, %s299_s17, %s300_s18  }
   0x6   :  { %s301_s19 = smov [#allocation5]  }
   0x7   :  { %s29_s20 = sshll.u32 %s301_s19, 4  ;;  %s30_s20 = int_to_ptr.vmem [resolvable:$true] %s29_s20 }
   0x8   :  { %35 = dma.hbm_to_vmem [thread:$0]  %s28_s16, 256, %s30_s20, [#allocation6], %s299_s17, %s299_s17, %s300_s18  }
   0x9   :  { %292 = dma.done.wait [#allocation3], 256  }
   0xa   :  { %293 = vsyncadd [#allocation3], 4294967040 }
   0xb   :  { %294 = dma.done.wait [#allocation6], 256  }
   0xc   :  { %295 = vsyncadd [#allocation6], 4294967040  ;;  %v302_v0 = vmov 8.0   ;;  %vm48_vm0 = vcmask 261120   ;;  %v44_v2 = vld [vmem:[#allocation2] sm:$0xff]  ;;  %v46_v3 = vld [vmem:[#allocation5] sm:$0xff] }
   0xd   :  { %210 = vrcp.f32 %v302_v0  ;;  %v45_v4 = vld [vmem:[#allocation2 + $0x8] sm:$0xff]  ;;  %v49_v5 = vsel %vm48_vm0, %v44_v2, 0.0  ;;  %v72_v7 = vsel %vm48_vm0, %v46_v3, 0.0  ;;  %v47_v8 = vld [vmem:[#allocation5 + $0x8] sm:$0xff]  ;;  %s303_s0 = smov [#allocation7]   ;;  %s190_s23 = sshll.u32 %s373_s2, 4  ;;  %s191_s23 = int_to_ptr.hbm [resolvable:$true] %s190_s23 }
   0xe   :  { %v50_v9 = vrot.slane %v49_v5, 4  ;;  %v73_v10 = vrot.slane %v72_v7, 4  ;;  %v56_v11 = vsel %vm48_vm0, %v45_v4, 0.0  ;;  %v79_v12 = vsel %vm48_vm0, %v47_v8, 0.0  ;;  %s188_s1 = sshll.u32 %s303_s0, 4  ;;  %s189_s1 = int_to_ptr.vmem [resolvable:$true] %s188_s1 }
   0xf   :  { %v57_v14 = vrot.slane %v56_v11, 4  ;;  %v80_v15 = vrot.slane %v79_v12, 4 }
  0x10   :  { %v51_v16 = vadd.f32 %v50_v9, %v49_v5  ;;  %v74_v17 = vadd.f32 %v73_v10, %v72_v7 }
  0x11   :  { %v58_v19 = vadd.f32 %v57_v14, %v56_v11  ;;  %v81_v20 = vadd.f32 %v80_v15, %v79_v12 }
  0x12   :  { %v52_v21 = vrot.slane %v51_v16, 2  ;;  %v75_v22 = vrot.slane %v74_v17, 2 }
  0x13   :  { %v211_v1 = vpop.eup %210  ;;  %v59_v24 = vrot.slane %v58_v19, 2  ;;  %v82_v25 = vrot.slane %v81_v20, 2 }
  0x14   :  { %v64_v6 = vmul.f32 8.0, %v211_v1  ;;  %v53_v26 = vadd.f32 %v52_v21, %v51_v16  ;;  %vm68_vm1 = vweird.f32 %v211_v1  ;;  %v76_v27 = vadd.f32 %v75_v22, %v74_v17 }
  0x15   :  { %v60_v28 = vadd.f32 %v59_v24, %v58_v19  ;;  %v83_v29 = vadd.f32 %v82_v25, %v81_v20 }
  0x16   :  { %v65_v13 = vsub.f32 1.0, %v64_v6  ;;  %v54_v30 = vrot.slane %v53_v26, 1  ;;  %v77_v31 = vrot.slane %v76_v27, 1 }
  0x17   :  { %v61_v33 = vrot.slane %v60_v28, 1  ;;  %v84_v34 = vrot.slane %v83_v29, 1 }
  0x18   :  { %v66_v18 = vmul.f32 %v211_v1, %v65_v13  ;;  %v55_v35 = vadd.f32 %v54_v30, %v53_v26  ;;  %v78_v36 = vadd.f32 %v77_v31, %v76_v27 }
  0x19   :  { %v62_v37 = vadd.f32 %v61_v33, %v60_v28  ;;  %v85_v38 = vadd.f32 %v84_v34, %v83_v29 }
  0x1a   :  { %v67_v23 = vadd.f32 %v211_v1, %v66_v18 }
  0x1c   :  { %v69_v32 = vsel %vm68_vm1, %v211_v1, %v67_v23 }
  0x1d   :  { %v70_v39 = vmul.f32 %v69_v32, %v55_v35  ;;  %v335_v40 = vmul.f32 %v78_v36, %v69_v32  ;;  %v71_v41 = vmul.f32 %v69_v32, %v62_v37  ;;  %v337_v42 = vmul.f32 %v85_v38, %v69_v32 }
  0x1f   :  { %v339_v43 = vsub.f32 %v44_v2, %v70_v39  ;;  %v90_v44 = vsub.f32 %v46_v3, %v335_v40  ;;  %v342_v45 = vsub.f32 %v45_v4, %v71_v41  ;;  %v91_v46 = vsub.f32 %v47_v8, %v337_v42 }
  0x21   :  { %v92_v47 = vmul.f32 %v339_v43, %v339_v43  ;;  %v108_v48 = vmul.f32 %v90_v44, %v90_v44  ;;  %v93_v49 = vmul.f32 %v342_v45, %v342_v45  ;;  %v109_v50 = vmul.f32 %v91_v46, %v91_v46 }
  0x23   :  { %v94_v51 = vsel %vm48_vm0, %v92_v47, 0.0  ;;  %v110_v52 = vsel %vm48_vm0, %v108_v48, 0.0  ;;  %v101_v55 = vsel %vm48_vm0, %v93_v49, 0.0  ;;  %v117_v56 = vsel %vm48_vm0, %v109_v50, 0.0 }
  0x24   :  { %v95_v53 = vrot.slane %v94_v51, 4  ;;  %v111_v54 = vrot.slane %v110_v52, 4  ;;  %v102_v57 = vrot.slane %v101_v55, 4  ;;  %v118_v58 = vrot.slane %v117_v56, 4 }
  0x26   :  { %v96_v59 = vadd.f32 %v95_v53, %v94_v51  ;;  %v112_v60 = vadd.f32 %v111_v54, %v110_v52  ;;  %v103_v61 = vadd.f32 %v102_v57, %v101_v55  ;;  %v119_v62 = vadd.f32 %v118_v58, %v117_v56 }
  0x28   :  { %v97_v63 = vrot.slane %v96_v59, 2  ;;  %v113_v0 = vrot.slane %v112_v60, 2  ;;  %v104_v1 = vrot.slane %v103_v61, 2  ;;  %v120_v2 = vrot.slane %v119_v62, 2 }
  0x2a   :  { %v98_v3 = vadd.f32 %v97_v63, %v96_v59  ;;  %v114_v4 = vadd.f32 %v113_v0, %v112_v60  ;;  %v105_v5 = vadd.f32 %v104_v1, %v103_v61  ;;  %v121_v6 = vadd.f32 %v120_v2, %v119_v62 }
  0x2c   :  { %v99_v7 = vrot.slane %v98_v3, 1  ;;  %v115_v8 = vrot.slane %v114_v4, 1  ;;  %v106_v9 = vrot.slane %v105_v5, 1  ;;  %v122_v10 = vrot.slane %v121_v6, 1 }
  0x2e   :  { %v100_v11 = vadd.f32 %v99_v7, %v98_v3  ;;  %v116_v12 = vadd.f32 %v115_v8, %v114_v4  ;;  %v107_v13 = vadd.f32 %v106_v9, %v105_v5  ;;  %v123_v14 = vadd.f32 %v122_v10, %v121_v6 }
  0x30   :  { %v124_v15 = vadd.f32 2.3e-08, %v100_v11  ;;  %v148_v16 = vadd.f32 2.3e-08, %v116_v12  ;;  %v125_v17 = vadd.f32 2.3e-08, %v107_v13 }
  0x31   :  { %v149_v18 = vadd.f32 2.3e-08, %v123_v14 }
  0x32   :  { %v126_v19 = vmul.f32 %v124_v15, %v69_v32  ;;  %v150_v20 = vmul.f32 %v148_v16, %v69_v32  ;;  %v127_v21 = vmul.f32 %v125_v17, %v69_v32 }
  0x33   :  { %v151_v22 = vmul.f32 %v149_v18, %v69_v32 }
  0x34   :  { %212 = vrsqrt.f32 %v126_v19  ;;  %vm134_vm2 = vweird.f32 %v126_v19  ;;  %vm144_vm4 = vweird.f32 %v127_v21  ;;  %vm159_vm7 = vcmp.eq.f32.partialorder %v150_v20, inf }
  0x35   :  { %214 = vrsqrt.f32 %v150_v20  ;;  %v162_v50 = vand.u32 2147483648, %v150_v20  ;;  %vm161_vm8 = vcmp.eq.f32.partialorder %v150_v20, 0.0  ;;  %vm171_vm10 = vcmp.eq.f32.partialorder %v151_v22, inf }
  0x36   :  { %216 = vrsqrt.f32 %v127_v21  ;;  %v174_v55 = vand.u32 2147483648, %v151_v22  ;;  %vm173_vm11 = vcmp.eq.f32.partialorder %v151_v22, 0.0 }
  0x37   :  { %218 = vrsqrt.f32 %v151_v22 }
  0x3a   :  { %v213_v23 = vpop.eup %212 }
  0x3b   :  { %v215_v24 = vpop.eup %214  ;;  %v129_v25 = vmul.f32 %v213_v23, %v126_v19  ;;  %vm135_vm3 = vweird.f32 %v213_v23 }
  0x3c   :  { %v217_v26 = vpop.eup %216  ;;  %v153_v27 = vmul.f32 %v215_v24, %v150_v20  ;;  %vm353_vm6 = vmor %vm134_vm2, %vm135_vm3 }
  0x3d   :  { %v219_v28 = vpop.eup %218  ;;  %v130_v29 = vmul.f32 %v213_v23, %v129_v25  ;;  %v139_v30 = vmul.f32 %v217_v26, %v127_v21  ;;  %vm145_vm5 = vweird.f32 %v217_v26 }
  0x3e   :  { %v154_v31 = vmul.f32 %v215_v24, %v153_v27  ;;  %v165_v33 = vmul.f32 %v219_v28, %v151_v22  ;;  %vm146_vm9 = vmor %vm144_vm4, %vm145_vm5 }
  0x3f   :  { %v131_v34 = vmul.f32 0.5, %v130_v29  ;;  %v140_v35 = vmul.f32 %v217_v26, %v139_v30 }
  0x40   :  { %v155_v36 = vmul.f32 0.5, %v154_v31  ;;  %v166_v37 = vmul.f32 %v219_v28, %v165_v33 }
  0x41   :  { %v132_v38 = vsub.f32 1.5, %v131_v34  ;;  %v141_v32 = vmul.f32 0.5, %v140_v35 }
  0x42   :  { %v156_v39 = vsub.f32 1.5, %v155_v36  ;;  %v167_v41 = vmul.f32 0.5, %v166_v37 }
  0x43   :  { %v133_v44 = vmul.f32 %v213_v23, %v132_v38  ;;  %v142_v46 = vsub.f32 1.5, %v141_v32 }
  0x44   :  { %v157_v48 = vmul.f32 %v215_v24, %v156_v39  ;;  %v168_v49 = vsub.f32 1.5, %v167_v41 }
  0x45   :  { %v143_v51 = vmul.f32 %v217_v26, %v142_v46  ;;  %v137_v54 = vsel %vm353_vm6, %v213_v23, %v133_v44 }
  0x46   :  { %v158_v52 = vmul.f32 %v157_v48, %v150_v20  ;;  %v169_v53 = vmul.f32 %v219_v28, %v168_v49 }
  0x47   :  { %v147_v59 = vsel %vm146_vm9, %v217_v26, %v143_v51 }
  0x48   :  { %v160_v56 = vsel %vm159_vm7, %v150_v20, %v158_v52  ;;  %v170_v57 = vmul.f32 %v169_v53, %v151_v22 }
  0x49   :  { %v163_v58 = vsel %vm161_vm8, %v162_v50, %v160_v56 }
  0x4a   :  { %v176_v60 = vmul.f32 %v163_v58, %v137_v54  ;;  %v172_v61 = vsel %vm171_vm10, %v151_v22, %v170_v57 }
  0x4b   :  { %v175_v62 = vsel %vm173_vm11, %v174_v55, %v172_v61 }
  0x4c   :  { %v178_v63 = vmul.f32 %v176_v60, %v339_v43  ;;  %v177_v0 = vmul.f32 %v175_v62, %v147_v59 }
  0x4e   :  { %v180_v1 = vadd.f32 %v178_v63, %v335_v40  ;;  %v179_v2 = vmul.f32 %v177_v0, %v342_v45 }
  0x50   :  { %182 = vst.msk [vmem:[#allocation7] sm:$0xff] %vm48_vm0, %v180_v1  ;;  %v181_v3 = vadd.f32 %v179_v2, %v337_v42 }
  0x52   :  { %183 = vst.msk [vmem:[#allocation7 + $0x8] sm:$0xff] %vm48_vm0, %v181_v3 }
  0x53   :  { %196 = dma.vmem_to_hbm [thread:$0]  %s189_s1, 256, %s191_s23, [#allocation4], %s299_s17, %s299_s17, %s300_s18  }
  0x54   :  { %296 = dma.done.wait [#allocation4], 256  }
  0x55   :  { %297 = vsyncadd [#allocation4], 4294967040 }
  0x56   :  { %201 = vsyncpa [#allocation3], 1 }
  0x57   :  { %202 = vsyncpa [#allocation6], 1 }
  0x58   :  { %203 = vsyncpa [#allocation4], 1 }

</bundles_post_ra>
